<compile_context>
chip_gen: v5e
topology: v5e:2x2
jax: 0.10.0
libtpu: 0.0.40
codegen_flags: <defaults>
</compile_context>

<pallas_src>
import functools

import jax
import jax.numpy as jnp
from jax.experimental import pallas as pl
from jax.experimental.pallas import tpu as pltpu


MAX_PIXEL_TILE = 16384   # pixels per grid step (lane axis). Amortizes the
                         # ~0.35us/step overhead; per-step footprint stays
                         # ~10-15 MiB (incl. 8-sublane padding + double
                         # buffering), well inside the explicit VMEM budget.

VMEM_LIMIT_BYTES = 48 * 1024 * 1024   # explicit budget; safe on v5e/v6e
                                      # (128 MiB) and v7x (64 MiB physical).


def _disp2depth(x):
    # disparity2depth / depth2disparity: 1/x with zero guard (identical ops).
    # approx=True -> EUP vrcp; keeps the single EUP slot free for softplus
    # exp/log work (dominant on v6e/v7x), guard select removes the x==0 inf.
    return jnp.where(x > 0.0, pl.reciprocal(x, approx=True), 0.0)


def _softplus(y):
    # numerically stable softplus -> strictly positive "disparity-like" output
    return jnp.maximum(y, 0.0) + jnp.log(1.0 + jnp.exp(-jnp.abs(y)))


# --------------------------------------------------------------------------
# Pass 1: per-batch masked min / denom of the sparse depth prior
#         (zero_one_normalize(sparse_depths, sparse_masks, affine_only=True))
#   * input viewed as (B, rows=8, P/8) -> sublane-dense vregs
#   * running min/max kept elementwise in a block-shaped VMEM scratch,
#     XLU collapse only in the final grid step
#   * validity derived from depth > 0 (prior is pre-masked); ragged tail
#     guarded with a column iota.
# --------------------------------------------------------------------------
def _minmax_kernel(sd_ref, mn_ref, den_ref, run_min, run_max, *, n_valid):
    j = pl.program_id(1)
    tc = sd_ref.shape[-1]

    @pl.when(j == 0)
    def _():
        run_min[...] = jnp.full(run_min.shape, jnp.inf, jnp.float32)
        run_max[...] = jnp.full(run_max.shape, -jnp.inf, jnp.float32)

    d = sd_ref[0]                                              # (rows, tc)
    col = jax.lax.broadcasted_iota(jnp.int32, d.shape, 1) + j * tc
    valid = (d > 0.0) & (col < n_valid)       # mask == depth>0, tail guard
    run_min[...] = jnp.minimum(run_min[...], jnp.where(valid, d, jnp.inf))
    run_max[...] = jnp.maximum(run_max[...], jnp.where(valid, d, -jnp.inf))

    @pl.when(j == pl.num_programs(1) - 1)
    def _():
        mn = jnp.min(jnp.min(run_min[...], axis=1, keepdims=True),
                     axis=0, keepdims=True)                    # (1, 1)
        mx = jnp.max(jnp.max(run_max[...], axis=1, keepdims=True),
                     axis=0, keepdims=True)
        diff = mx - mn
        den = jnp.where(diff == 0.0, 1.0, diff)
        # NOTE: like the PyTorch reference, an all-empty prior leaves
        # mn=+inf / den=-inf and poisons that batch downstream.
        mn_ref[...] = mn.reshape(1, 1, 1)
        den_ref[...] = den.reshape(1, 1, 1)


def masked_min_denom(sd, max_pixels=MAX_PIXEL_TILE):
    b, _, p = sd.shape
    # Sublane-dense view (free row-major reshape).  Fallback rows=1 keeps
    # correctness for pixel counts that are not a multiple of 8.
    rows = 8 if p % 8 == 0 else 1
    cols = p // rows
    sd_r = sd.reshape(b, rows, cols)
    tc = cols if cols <= max_pixels // rows else max_pixels // rows
    n_t = pl.cdiv(cols, tc)

    kernel = functools.partial(_minmax_kernel, n_valid=cols)
    return pl.pallas_call(
        kernel,
        out_shape=(jax.ShapeDtypeStruct((b, 1, 1), jnp.float32),
                   jax.ShapeDtypeStruct((b, 1, 1), jnp.float32)),
        grid_spec=pltpu.PrefetchScalarGridSpec(
            num_scalar_prefetch=0,
            grid=(b, n_t),
            in_specs=[pl.BlockSpec((1, rows, tc), lambda i, j: (i, 0, j))],
            out_specs=(pl.BlockSpec((1, 1, 1), lambda i, j: (i, 0, 0)),
                       pl.BlockSpec((1, 1, 1), lambda i, j: (i, 0, 0))),
            scratch_shapes=[pltpu.VMEM((rows, tc), jnp.float32),
                            pltpu.VMEM((rows, tc), jnp.float32)]),
        compiler_params=pltpu.CompilerParams(
            dimension_semantics=("parallel", "arbitrary")),
    )(sd_r)


# --------------------------------------------------------------------------
# Pass 2: fully fused per-pixel pipeline (one kernel; inputs read once from
#         HBM, one lane-dense HBM write of the metric depth).
#   Persistent (8, tile) f32 scratch holds the matmul input; channel layout
#   (K axis of the MXU matmuls):
#     stage 1 (completion stub):   [r, g, b, sparse_depth, valid, 0, 0, 0]
#     stage 2 (conditioned MDE):   [r, g, b, uctn, global_cond, comp_cond, 0, 0]
#   img rows (0:3) are written once and reused by both matmuls.
# --------------------------------------------------------------------------
def _fused_pixel_kernel(mn_ref, den_ref, iden_ref, img_ref, sd_ref,
                        cw1_ref, cb1_ref, cw2_ref, cb2_ref,
                        mw1_ref, mb1_ref, mw2_ref, mb2_ref,
                        out_ref, x_scr):
    i = pl.program_id(0)
    mn = mn_ref[i]            # per-batch scalars from SMEM (no VMEM pipeline)
    den = den_ref[i]
    inv_den = iden_ref[i]

    img = img_ref[0]                                       # (3, T) f32
    sd = sd_ref[0]                                         # (1, T) f32
    t = x_scr.shape[1]

    # ---- stage-1 input assembly (in-place, no concatenate)
    x_scr[0:3, :] = img
    x_scr[3:4, :] = sd
    # Validity recomputed from the (pre-masked) sparse prior: depth > 0.
    x_scr[4:5, :] = jnp.where(sd > 0.0, 1.0, 0.0)
    x_scr[5:8, :] = jnp.zeros((3, t), jnp.float32)         # keep padded K finite

    # ---- DepthCompletion stub -> (global, scaled, uncertainty) disparities
    x0 = x_scr[...].astype(jnp.bfloat16)                   # (8, T)
    h0 = jnp.dot(cw1_ref[...], x0,
                 preferred_element_type=jnp.float32) + cb1_ref[...]
    h0 = jnp.maximum(h0, 0.0)
    y0 = jnp.dot(cw2_ref[...], h0.astype(jnp.bfloat16),
                 preferred_element_type=jnp.float32) + cb2_ref[...]
    comp = _softplus(y0)                                   # (3, T)

    # ---- condition channels, batched as one (2, T) op:
    #      disparity -> depth -> affine normalize (scalar mul) -> disparity
    cond = _disp2depth((_disp2depth(comp[0:2]) - mn) * inv_den)   # (2, T)

    # ---- stage-2 input assembly (img rows untouched; rows 6:8 stay zero)
    x_scr[3:4, :] = comp[2:3]                              # uncertainty
    x_scr[4:6, :] = cond                                   # [global, comp]

    # ---- conditioned-MDE stub -> metric disparity
    x1 = x_scr[...].astype(jnp.bfloat16)
    h1 = jnp.dot(mw1_ref[...], x1,
                 preferred_element_type=jnp.float32) + mb1_ref[...]
    h1 = jnp.maximum(h1, 0.0)
    disp = _softplus(jnp.dot(mw2_ref[...], h1.astype(jnp.bfloat16),
                             preferred_element_type=jnp.float32) + mb2_ref[...])

    # ---- metric depth = disparity2depth(metric_disp) * denom + masked_min
    # Lane-dense (1, T) f32 store.  NOTE: with a ragged final tile the
    # out-of-bounds lanes carry garbage, but all ops above are lane-local
    # (matmuls contract over channels only), so garbage never leaks into
    # valid lanes and the partial store drops the OOB portion.
    out_ref[0] = _disp2depth(disp) * den + mn


def fused_prior_depth(img, sd, masked_min, denom, inv_denom, params, tile):
    b, _, p = img.shape
    n_t = pl.cdiv(p, tile)
    hd = params["comp_w1"].shape[0]

    def hw_spec(c):
        return pl.BlockSpec((1, c, tile), lambda i, j: (i, 0, j))

    # Per-batch scalars live in SMEM: free scalar reads, no (1,1,1) VMEM
    # double-buffer pipelines.
    smem_spec = pl.BlockSpec(memory_space=pltpu.MemorySpace.SMEM)

    # Weights: whole-array blocks with constant index_map; the pipeline skips
    # the DMA when the block index does not change between grid steps.
    def full(shape):
        return pl.BlockSpec(shape, lambda i, j: (0, 0))

    return pl.pallas_call(
        _fused_pixel_kernel,
        out_shape=jax.ShapeDtypeStruct((b, 1, p), jnp.float32),
        grid_spec=pltpu.PrefetchScalarGridSpec(
            num_scalar_prefetch=0,
            grid=(b, n_t),
            in_specs=[
                smem_spec, smem_spec, smem_spec,
                hw_spec(3), hw_spec(1),
                full((hd, 8)), full((hd, 1)), full((3, hd)), full((3, 1)),
                full((hd, 8)), full((hd, 1)), full((1, hd)), full((1, 1)),
            ],
            out_specs=pl.BlockSpec((1, 1, tile), lambda i, j: (i, 0, j)),
            scratch_shapes=[pltpu.VMEM((8, tile), jnp.float32)],
        ),
        compiler_params=pltpu.CompilerParams(
            dimension_semantics=("parallel", "parallel"),
            vmem_limit_bytes=VMEM_LIMIT_BYTES),
    )(masked_min, denom, inv_denom, img, sd,
      params["comp_w1"], params["comp_b1"], params["comp_w2"], params["comp_b2"],
      params["cmde_w1"], params["cmde_b1"], params["cmde_w2"], params["cmde_b2"])


# --------------------------------------------------------------------------
# Parameter init (deterministic, synthetic weights)
# Weight matrices are [out, in] (we compute W @ x with pixels on lanes) in
# bf16 (MXU-native); the first-layer matrices are zero-padded to in=8 so the
# matmul K axis always matches the (8, tile) input scratch.  Biases stay f32.
# --------------------------------------------------------------------------
def init_params(key, hidden=32):
    ks = jax.random.split(key, 8)
    s = 0.5
    f32, bf16 = jnp.float32, jnp.bfloat16

    def pad8(w):  # [out, in] -> [out, 8], zero columns for unused channels
        return jnp.pad(w, ((0, 0), (0, 8 - w.shape[1])))

    return {
        # completion stub: [r,g,b, sparse_depth, valid] -> [global, scaled, uctn]
        "comp_w1": pad8(s * jax.random.normal(ks[0], (hidden, 5), f32)).astype(bf16),
        "comp_b1": s * jax.random.normal(ks[1], (hidden, 1), f32),
        "comp_w2": (s * jax.random.normal(ks[2], (3, hidden), f32)).astype(bf16),
        "comp_b2": s * jax.random.normal(ks[3], (3, 1), f32),
        # conditioned-MDE stub: [r,g,b, uctn, global_cond, comp_cond] -> disparity
        "cmde_w1": pad8(s * jax.random.normal(ks[4], (hidden, 6), f32)).astype(bf16),
        "cmde_b1": s * jax.random.normal(ks[5], (hidden, 1), f32),
        "cmde_w2": (s * jax.random.normal(ks[6], (1, hidden), f32)).astype(bf16),
        "cmde_b2": s * jax.random.normal(ks[7], (1, 1), f32),
    }


# --------------------------------------------------------------------------
# Forward pass (mirrors PriorDepthAnything.forward, coarse_only=False,
#               normalize_depth=True, err_condition=True)
# --------------------------------------------------------------------------
def priorda_forward(images, sparse_depths, sparse_masks, params,
                    max_tile=MAX_PIXEL_TILE):
    # sparse_masks is accepted for API parity with the PyTorch module but is
    # never read from HBM: the SparseSampler prior is pre-masked, so validity
    # is recomputed in-kernel as sparse_depth > 0.
    # TODO(synk): requires valid sparse depths to be strictly positive.
    del sparse_masks
    b, c, h, w = images.shape
    assert c == 3
    p = h * w
    # Lane-dense pixel tile: full pixel extent if it fits a single block,
    # otherwise a multiple-of-128 tile with a masked / dropped ragged tail.
    tile = p if p <= max_tile else max_tile

    # Channel-planar views: reshapes only, no transposes (no HBM round trip).
    img = images.reshape(b, 3, p).astype(jnp.float32)
    sd = sparse_depths.reshape(b, 1, p).astype(jnp.float32)

    # Pass 1: zero_one_normalize(sparse_depths, sparse_masks, affine_only=True)
    masked_min, denom = masked_min_denom(sd)
    mn = masked_min.reshape(b)
    den = denom.reshape(b)
    inv_den = 1.0 / den        # tiny (B,) op; per-pixel normalize becomes a mul

    # Pass 2: fused completion MLP -> condition -> conditioned MDE -> denorm.
    depth = fused_prior_depth(img, sd, mn, den, inv_den, params, tile)
    return depth.reshape(b, 1, h, w)


if __name__ == "__main__":
    key = jax.random.PRNGKey(0)
    B, H, W = 2, 16, 16
    k1, k2, k3, k4 = jax.random.split(key, 4)

    images = jax.random.uniform(k1, (B, 3, H, W), jnp.float32)
    depths = jax.random.uniform(k2, (B, 1, H, W), jnp.float32,
                                minval=0.5, maxval=5.0)
    sparse_masks = jax.random.uniform(k3, (B, 1, H, W)) < 0.3
    sparse_masks = sparse_masks.at[:, :, 0, 0].set(True)        # >=1 valid point
    sparse_depths = depths * sparse_masks.astype(jnp.float32)

    params = init_params(k4)

    out = jax.jit(priorda_forward)(images, sparse_depths, sparse_masks, params)
    out = jax.block_until_ready(out)
    assert out.shape == (B, 1, H, W) and out.dtype == jnp.float32
    assert bool(jnp.all(jnp.isfinite(out)))
    print("KERNEL_OK")
</pallas_src>

<mosaic_0001>
module attributes {stable_mosaic.version = 11 : i64} {
  func.func @_minmax_kernel(%arg0: i32, %arg1: i32, %arg2: memref<1x8x32xf32, #tpu.memory_space<vmem>>, %arg3: memref<1x1x1xf32, #tpu.memory_space<vmem>>, %arg4: memref<1x1x1xf32, #tpu.memory_space<vmem>>, %arg5: memref<8x32xf32, #tpu.memory_space<vmem>>, %arg6: memref<8x32xf32, #tpu.memory_space<vmem>>) attributes {dimension_semantics = [#tpu.dimension_semantics<parallel>, #tpu.dimension_semantics<arbitrary>], iteration_bounds = array<i64: 2, 1>, scalar_prefetch = 0 : i64, scratch_operands = 2 : i64, tpu.core_type = #tpu.core_type<tc>, window_params = [{transform_indices = @transform_0, window_bounds = array<i64: 1, 8, 32>}, {transform_indices = @transform_1, window_bounds = array<i64: 1, 1, 1>}, {transform_indices = @transform_2, window_bounds = array<i64: 1, 1, 1>}]} {
    %c0_i32 = arith.constant 0 : i32
    %0 = arith.cmpi eq, %arg1, %c0_i32 : i32
    %1 = arith.extui %0 : i1 to i32
    %c0_i32_0 = arith.constant 0 : i32
    %2 = arith.cmpi ne, %1, %c0_i32_0 : i32
    scf.if %2 {
      %cst_16 = arith.constant 0x7F800000 : f32
      %27 = vector.broadcast %cst_16 : f32 to vector<8x32xf32>
      %c0_17 = arith.constant 0 : index
      %c0_18 = arith.constant 0 : index
      %28 = vector.load %arg5[%c0_17, %c0_18] : memref<8x32xf32, #tpu.memory_space<vmem>>, vector<8x32xf32>
      tpu.vector_store %arg5[%c0_17, %c0_18], %27 {strides = array<i32>} : memref<8x32xf32, #tpu.memory_space<vmem>>, vector<8x32xf32>,
      %cst_19 = arith.constant 0xFF800000 : f32
      %29 = vector.broadcast %cst_19 : f32 to vector<8x32xf32>
      %c0_20 = arith.constant 0 : index
      %c0_21 = arith.constant 0 : index
      %30 = vector.load %arg6[%c0_20, %c0_21] : memref<8x32xf32, #tpu.memory_space<vmem>>, vector<8x32xf32>
      tpu.vector_store %arg6[%c0_20, %c0_21], %29 {strides = array<i32>} : memref<8x32xf32, #tpu.memory_space<vmem>>, vector<8x32xf32>,
    } else {
    }
    %c0 = arith.constant 0 : index
    %c0_1 = arith.constant 0 : index
    %c0_2 = arith.constant 0 : index
    %3 = vector.load %arg2[%c0, %c0_1, %c0_2] : memref<1x8x32xf32, #tpu.memory_space<vmem>>, vector<1x8x32xf32>
    %4 = vector.shape_cast %3 : vector<1x8x32xf32> to vector<8x32xf32>
    %5 = tpu.iota {dimensions = array<i32: 1>} : vector<8x32xi32>
    %c32_i32 = arith.constant 32 : i32
    %6 = arith.muli %arg1, %c32_i32 : i32
    %7 = vector.broadcast %6 : i32 to vector<8x32xi32>
    %8 = arith.addi %5, %7 : vector<8x32xi32>
    %cst = arith.constant 0.000000e+00 : f32
    %9 = vector.broadcast %cst : f32 to vector<8x32xf32>
    %10 = arith.cmpf ogt, %4, %9 : vector<8x32xf32>
    %c32_i32_3 = arith.constant 32 : i32
    %11 = vector.broadcast %c32_i32_3 : i32 to vector<8x32xi32>
    %12 = arith.cmpi slt, %8, %11 : vector<8x32xi32>
    %13 = arith.andi %10, %12 : vector<8x32xi1>
    %c0_4 = arith.constant 0 : index
    %c0_5 = arith.constant 0 : index
    %14 = vector.load %arg5[%c0_4, %c0_5] : memref<8x32xf32, #tpu.memory_space<vmem>>, vector<8x32xf32>
    %cst_6 = arith.constant 0x7F800000 : f32
    %15 = vector.broadcast %cst_6 : f32 to vector<8x32xf32>
    %16 = arith.select %13, %4, %15 : vector<8x32xi1>, vector<8x32xf32>
    %17 = arith.minimumf %14, %16 : vector<8x32xf32>
    %c0_7 = arith.constant 0 : index
    %c0_8 = arith.constant 0 : index
    %18 = vector.load %arg5[%c0_7, %c0_8] : memref<8x32xf32, #tpu.memory_space<vmem>>, vector<8x32xf32>
    tpu.vector_store %arg5[%c0_7, %c0_8], %17 {strides = array<i32>} : memref<8x32xf32, #tpu.memory_space<vmem>>, vector<8x32xf32>,
    %c0_9 = arith.constant 0 : index
    %c0_10 = arith.constant 0 : index
    %19 = vector.load %arg6[%c0_9, %c0_10] : memref<8x32xf32, #tpu.memory_space<vmem>>, vector<8x32xf32>
    %cst_11 = arith.constant 0xFF800000 : f32
    %20 = vector.broadcast %cst_11 : f32 to vector<8x32xf32>
    %21 = arith.select %13, %4, %20 : vector<8x32xi1>, vector<8x32xf32>
    %22 = arith.maximumf %19, %21 : vector<8x32xf32>
    %c0_12 = arith.constant 0 : index
    %c0_13 = arith.constant 0 : index
    %23 = vector.load %arg6[%c0_12, %c0_13] : memref<8x32xf32, #tpu.memory_space<vmem>>, vector<8x32xf32>
    tpu.vector_store %arg6[%c0_12, %c0_13], %22 {strides = array<i32>} : memref<8x32xf32, #tpu.memory_space<vmem>>, vector<8x32xf32>,
    %c0_i32_14 = arith.constant 0 : i32
    %24 = arith.cmpi eq, %arg1, %c0_i32_14 : i32
    %25 = arith.extui %24 : i1 to i32
    %c0_i32_15 = arith.constant 0 : i32
    %26 = arith.cmpi ne, %25, %c0_i32_15 : i32
    scf.if %26 {
      %c0_16 = arith.constant 0 : index
      %c0_17 = arith.constant 0 : index
      %27 = vector.load %arg5[%c0_16, %c0_17] : memref<8x32xf32, #tpu.memory_space<vmem>>, vector<8x32xf32>
      %cst_18 = arith.constant dense<0x7F800000> : vector<8xf32>
      %28 = vector.multi_reduction <minimumf>, %27, %cst_18 [1] : vector<8x32xf32> to vector<8xf32>
      %29 = vector.shape_cast %28 : vector<8xf32> to vector<8x1xf32>
      %cst_19 = arith.constant dense<0x7F800000> : vector<1xf32>
      %30 = vector.multi_reduction <minimumf>, %29, %cst_19 [0] : vector<8x1xf32> to vector<1xf32>
      %31 = vector.shape_cast %30 : vector<1xf32> to vector<1x1xf32>
      %c0_20 = arith.constant 0 : index
      %c0_21 = arith.constant 0 : index
      %32 = vector.load %arg6[%c0_20, %c0_21] : memref<8x32xf32, #tpu.memory_space<vmem>>, vector<8x32xf32>
      %cst_22 = arith.constant dense<0xFF800000> : vector<8xf32>
      %33 = vector.multi_reduction <maximumf>, %32, %cst_22 [1] : vector<8x32xf32> to vector<8xf32>
      %34 = vector.shape_cast %33 : vector<8xf32> to vector<8x1xf32>
      %cst_23 = arith.constant dense<0xFF800000> : vector<1xf32>
      %35 = vector.multi_reduction <maximumf>, %34, %cst_23 [0] : vector<8x1xf32> to vector<1xf32>
      %36 = vector.shape_cast %35 : vector<1xf32> to vector<1x1xf32>
      %37 = arith.subf %36, %31 : vector<1x1xf32>
      %cst_24 = arith.constant 0.000000e+00 : f32
      %38 = vector.broadcast %cst_24 : f32 to vector<1x1xf32>
      %39 = arith.cmpf oeq, %37, %38 : vector<1x1xf32>
      %cst_25 = arith.constant 1.000000e+00 : f32
      %40 = vector.broadcast %cst_25 : f32 to vector<1x1xf32>
      %41 = arith.select %39, %40, %37 : vector<1x1xi1>, vector<1x1xf32>
      %42 = vector.shape_cast %31 : vector<1x1xf32> to vector<1x1x1xf32>
      %c0_26 = arith.constant 0 : index
      %c0_27 = arith.constant 0 : index
      %c0_28 = arith.constant 0 : index
      %43 = vector.load %arg3[%c0_26, %c0_27, %c0_28] : memref<1x1x1xf32, #tpu.memory_space<vmem>>, vector<1x1x1xf32>
      tpu.vector_store %arg3[%c0_26, %c0_27, %c0_28], %42 {strides = array<i32>} : memref<1x1x1xf32, #tpu.memory_space<vmem>>, vector<1x1x1xf32>,
      %44 = vector.shape_cast %41 : vector<1x1xf32> to vector<1x1x1xf32>
      %c0_29 = arith.constant 0 : index
      %c0_30 = arith.constant 0 : index
      %c0_31 = arith.constant 0 : index
      %45 = vector.load %arg4[%c0_29, %c0_30, %c0_31] : memref<1x1x1xf32, #tpu.memory_space<vmem>>, vector<1x1x1xf32>
      tpu.vector_store %arg4[%c0_29, %c0_30, %c0_31], %44 {strides = array<i32>} : memref<1x1x1xf32, #tpu.memory_space<vmem>>, vector<1x1x1xf32>,
    } else {
    }
    return
  }
  func.func @transform_0(%arg0: i32, %arg1: i32) -> (i32, i32, i32) {
    %c0_i32 = arith.constant 0 : i32
    %c0_i32_0 = arith.constant 0 : i32
    return %arg0, %c0_i32, %arg1 : i32, i32, i32
  }
  func.func @transform_1(%arg0: i32, %arg1: i32) -> (i32, i32, i32) {
    %c0_i32 = arith.constant 0 : i32
    %c0_i32_0 = arith.constant 0 : i32
    %c0_i32_1 = arith.constant 0 : i32
    return %arg0, %c0_i32, %c0_i32_0 : i32, i32, i32
  }
  func.func @transform_2(%arg0: i32, %arg1: i32) -> (i32, i32, i32) {
    %c0_i32 = arith.constant 0 : i32
    %c0_i32_0 = arith.constant 0 : i32
    %c0_i32_1 = arith.constant 0 : i32
    return %arg0, %c0_i32, %c0_i32_0 : i32, i32, i32
  }
}

module attributes {stable_mosaic.version = 11 : i64} {
  func.func @_fused_pixel_kernel(%arg0: i32, %arg1: i32, %arg2: memref<2xf32, #tpu.memory_space<smem>>, %arg3: memref<2xf32, #tpu.memory_space<smem>>, %arg4: memref<2xf32, #tpu.memory_space<smem>>, %arg5: memref<1x3x256xf32, #tpu.memory_space<vmem>>, %arg6: memref<1x1x256xf32, #tpu.memory_space<vmem>>, %arg7: memref<32x8xbf16, #tpu.memory_space<vmem>>, %arg8: memref<32x1xf32, #tpu.memory_space<vmem>>, %arg9: memref<3x32xbf16, #tpu.memory_space<vmem>>, %arg10: memref<3x1xf32, #tpu.memory_space<vmem>>, %arg11: memref<32x8xbf16, #tpu.memory_space<vmem>>, %arg12: memref<32x1xf32, #tpu.memory_space<vmem>>, %arg13: memref<1x32xbf16, #tpu.memory_space<vmem>>, %arg14: memref<1x1xf32, #tpu.memory_space<vmem>>, %arg15: memref<1x1x256xf32, #tpu.memory_space<vmem>>, %arg16: memref<8x256xf32, #tpu.memory_space<vmem>>) attributes {dimension_semantics = [#tpu.dimension_semantics<parallel>, #tpu.dimension_semantics<parallel>], iteration_bounds = array<i64: 2, 1>, scalar_prefetch = 0 : i64, scratch_operands = 1 : i64, tpu.core_type = #tpu.core_type<tc>, window_params = [{transform_indices = @transform_0, window_bounds = array<i64: 2>}, {transform_indices = @transform_1, window_bounds = array<i64: 2>}, {transform_indices = @transform_2, window_bounds = array<i64: 2>}, {transform_indices = @transform_3, window_bounds = array<i64: 1, 3, 256>}, {transform_indices = @transform_4, window_bounds = array<i64: 1, 1, 256>}, {pipeline_mode = #tpu.pipeline_mode<synchronous>, transform_indices = @transform_5, window_bounds = array<i64: 32, 8>}, {pipeline_mode = #tpu.pipeline_mode<synchronous>, transform_indices = @transform_6, window_bounds = array<i64: 32, 1>}, {pipeline_mode = #tpu.pipeline_mode<synchronous>, transform_indices = @transform_7, window_bounds = array<i64: 3, 32>}, {pipeline_mode = #tpu.pipeline_mode<synchronous>, transform_indices = @transform_8, window_bounds = array<i64: 3, 1>}, {pipeline_mode = #tpu.pipeline_mode<synchronous>, transform_indices = @transform_9, window_bounds = array<i64: 32, 8>}, {pipeline_mode = #tpu.pipeline_mode<synchronous>, transform_indices = @transform_10, window_bounds = array<i64: 32, 1>}, {pipeline_mode = #tpu.pipeline_mode<synchronous>, transform_indices = @transform_11, window_bounds = array<i64: 1, 32>}, {pipeline_mode = #tpu.pipeline_mode<synchronous>, transform_indices = @transform_12, window_bounds = array<i64: 1, 1>}, {transform_indices = @transform_13, window_bounds = array<i64: 1, 1, 256>}]} {
    %0 = arith.index_cast %arg0 : i32 to index
    %1 = memref.load %arg2[%0] : memref<2xf32, #tpu.memory_space<smem>>
    %2 = arith.index_cast %arg0 : i32 to index
    %3 = memref.load %arg3[%2] : memref<2xf32, #tpu.memory_space<smem>>
    %4 = arith.index_cast %arg0 : i32 to index
    %5 = memref.load %arg4[%4] : memref<2xf32, #tpu.memory_space<smem>>
    %c0 = arith.constant 0 : index
    %c0_0 = arith.constant 0 : index
    %c0_1 = arith.constant 0 : index
    %6 = vector.load %arg5[%c0, %c0_0, %c0_1] : memref<1x3x256xf32, #tpu.memory_space<vmem>>, vector<1x3x256xf32>
    %7 = vector.shape_cast %6 : vector<1x3x256xf32> to vector<3x256xf32>
    %c0_2 = arith.constant 0 : index
    %c0_3 = arith.constant 0 : index
    %c0_4 = arith.constant 0 : index
    %8 = vector.load %arg6[%c0_2, %c0_3, %c0_4] : memref<1x1x256xf32, #tpu.memory_space<vmem>>, vector<1x1x256xf32>
    %9 = vector.shape_cast %8 : vector<1x1x256xf32> to vector<1x256xf32>
    %c0_5 = arith.constant 0 : index
    %c0_6 = arith.constant 0 : index
    %10 = vector.load %arg16[%c0_5, %c0_6] : memref<8x256xf32, #tpu.memory_space<vmem>>, vector<3x256xf32>
    tpu.vector_store %arg16[%c0_5, %c0_6], %7 {strides = array<i32>} : memref<8x256xf32, #tpu.memory_space<vmem>>, vector<3x256xf32>,
    %c3 = arith.constant 3 : index
    %c0_7 = arith.constant 0 : index
    %11 = vector.load %arg16[%c3, %c0_7] : memref<8x256xf32, #tpu.memory_space<vmem>>, vector<1x256xf32>
    tpu.vector_store %arg16[%c3, %c0_7], %9 {strides = array<i32>} : memref<8x256xf32, #tpu.memory_space<vmem>>, vector<1x256xf32>,
    %cst = arith.constant 0.000000e+00 : f32
    %12 = vector.broadcast %cst : f32 to vector<1x256xf32>
    %13 = arith.cmpf ogt, %9, %12 : vector<1x256xf32>
    %cst_8 = arith.constant 1.000000e+00 : f32
    %cst_9 = arith.constant 0.000000e+00 : f32
    %14 = vector.broadcast %cst_8 : f32 to vector<1x256xf32>
    %15 = vector.broadcast %cst_9 : f32 to vector<1x256xf32>
    %16 = arith.select %13, %14, %15 : vector<1x256xi1>, vector<1x256xf32>
    %c4 = arith.constant 4 : index
    %c0_10 = arith.constant 0 : index
    %17 = vector.load %arg16[%c4, %c0_10] : memref<8x256xf32, #tpu.memory_space<vmem>>, vector<1x256xf32>
    tpu.vector_store %arg16[%c4, %c0_10], %16 {strides = array<i32>} : memref<8x256xf32, #tpu.memory_space<vmem>>, vector<1x256xf32>,
    %cst_11 = arith.constant 0.000000e+00 : f32
    %18 = vector.broadcast %cst_11 : f32 to vector<3x256xf32>
    %c5 = arith.constant 5 : index
    %c0_12 = arith.constant 0 : index
    %19 = vector.load %arg16[%c5, %c0_12] : memref<8x256xf32, #tpu.memory_space<vmem>>, vector<3x256xf32>
    tpu.vector_store %arg16[%c5, %c0_12], %18 {strides = array<i32>} : memref<8x256xf32, #tpu.memory_space<vmem>>, vector<3x256xf32>,
    %c0_13 = arith.constant 0 : index
    %c0_14 = arith.constant 0 : index
    %20 = vector.load %arg16[%c0_13, %c0_14] : memref<8x256xf32, #tpu.memory_space<vmem>>, vector<8x256xf32>
    %21 = arith.truncf %20 : vector<8x256xf32> to vector<8x256xbf16>
    %c0_15 = arith.constant 0 : index
    %c0_16 = arith.constant 0 : index
    %22 = vector.load %arg7[%c0_15, %c0_16] : memref<32x8xbf16, #tpu.memory_space<vmem>>, vector<32x8xbf16>
    %cst_17 = arith.constant dense<0.000000e+00> : vector<32x256xf32>
    %23 = tpu.matmul %22, %21, %cst_17 {dimension_numbers = #tpu.dot_dimension_numbers<[1], [0], [0], [1], [0, 0, 1, 1], [], []>} : vector<32x8xbf16>, vector<8x256xbf16>, vector<32x256xf32> -> vector<32x256xf32>
    %c0_18 = arith.constant 0 : index
    %c0_19 = arith.constant 0 : index
    %24 = vector.load %arg8[%c0_18, %c0_19] : memref<32x1xf32, #tpu.memory_space<vmem>>, vector<32x1xf32>
    %25 = vector.broadcast %24 : vector<32x1xf32> to vector<32x256xf32>
    %26 = arith.addf %23, %25 : vector<32x256xf32>
    %cst_20 = arith.constant 0.000000e+00 : f32
    %27 = vector.broadcast %cst_20 : f32 to vector<32x256xf32>
    %28 = arith.maximumf %26, %27 : vector<32x256xf32>
    %c0_21 = arith.constant 0 : index
    %c0_22 = arith.constant 0 : index
    %29 = vector.load %arg9[%c0_21, %c0_22] : memref<3x32xbf16, #tpu.memory_space<vmem>>, vector<3x32xbf16>
    %30 = arith.truncf %28 : vector<32x256xf32> to vector<32x256xbf16>
    %cst_23 = arith.constant dense<0.000000e+00> : vector<3x256xf32>
    %31 = tpu.matmul %29, %30, %cst_23 {dimension_numbers = #tpu.dot_dimension_numbers<[1], [0], [0], [1], [0, 0, 1, 1], [], []>} : vector<3x32xbf16>, vector<32x256xbf16>, vector<3x256xf32> -> vector<3x256xf32>
    %c0_24 = arith.constant 0 : index
    %c0_25 = arith.constant 0 : index
    %32 = vector.load %arg10[%c0_24, %c0_25] : memref<3x1xf32, #tpu.memory_space<vmem>>, vector<3x1xf32>
    %33 = vector.broadcast %32 : vector<3x1xf32> to vector<3x256xf32>
    %34 = arith.addf %31, %33 : vector<3x256xf32>
    %cst_26 = arith.constant 0.000000e+00 : f32
    %35 = vector.broadcast %cst_26 : f32 to vector<3x256xf32>
    %36 = arith.maximumf %34, %35 : vector<3x256xf32>
    %37 = math.absf %34 : vector<3x256xf32>
    %cst_27 = arith.constant 0.000000e+00 : f32
    %38 = vector.broadcast %cst_27 : f32 to vector<3x256xf32>
    %39 = arith.subf %38, %37 : vector<3x256xf32>
    %40 = math.exp %39 : vector<3x256xf32>
    %cst_28 = arith.constant 1.000000e+00 : f32
    %41 = vector.broadcast %cst_28 : f32 to vector<3x256xf32>
    %42 = arith.addf %41, %40 : vector<3x256xf32>
    %43 = math.log %42 : vector<3x256xf32>
    %44 = arith.addf %36, %43 : vector<3x256xf32>
    %45 = vector.extract_strided_slice %44 {offsets = [0, 0], sizes = [2, 256], strides = [1, 1]} : vector<3x256xf32> to vector<2x256xf32>
    %cst_29 = arith.constant 0.000000e+00 : f32
    %46 = vector.broadcast %cst_29 : f32 to vector<2x256xf32>
    %47 = arith.cmpf ogt, %45, %46 : vector<2x256xf32>
    %48 = tpu.reciprocal %45 {approx = true} : vector<2x256xf32> -> vector<2x256xf32>
    %cst_30 = arith.constant 0.000000e+00 : f32
    %49 = vector.broadcast %cst_30 : f32 to vector<2x256xf32>
    %50 = arith.select %47, %48, %49 : vector<2x256xi1>, vector<2x256xf32>
    %51 = vector.broadcast %1 : f32 to vector<2x256xf32>
    %52 = arith.subf %50, %51 : vector<2x256xf32>
    %53 = vector.broadcast %5 : f32 to vector<2x256xf32>
    %54 = arith.mulf %52, %53 : vector<2x256xf32>
    %cst_31 = arith.constant 0.000000e+00 : f32
    %55 = vector.broadcast %cst_31 : f32 to vector<2x256xf32>
    %56 = arith.cmpf ogt, %54, %55 : vector<2x256xf32>
    %57 = tpu.reciprocal %54 {approx = true} : vector<2x256xf32> -> vector<2x256xf32>
    %cst_32 = arith.constant 0.000000e+00 : f32
    %58 = vector.broadcast %cst_32 : f32 to vector<2x256xf32>
    %59 = arith.select %56, %57, %58 : vector<2x256xi1>, vector<2x256xf32>
    %60 = vector.extract_strided_slice %44 {offsets = [2, 0], sizes = [1, 256], strides = [1, 1]} : vector<3x256xf32> to vector<1x256xf32>
    %c3_33 = arith.constant 3 : index
    %c0_34 = arith.constant 0 : index
    %61 = vector.load %arg16[%c3_33, %c0_34] : memref<8x256xf32, #tpu.memory_space<vmem>>, vector<1x256xf32>
    tpu.vector_store %arg16[%c3_33, %c0_34], %60 {strides = array<i32>} : memref<8x256xf32, #tpu.memory_space<vmem>>, vector<1x256xf32>,
    %c4_35 = arith.constant 4 : index
    %c0_36 = arith.constant 0 : index
    %62 = vector.load %arg16[%c4_35, %c0_36] : memref<8x256xf32, #tpu.memory_space<vmem>>, vector<2x256xf32>
    tpu.vector_store %arg16[%c4_35, %c0_36], %59 {strides = array<i32>} : memref<8x256xf32, #tpu.memory_space<vmem>>, vector<2x256xf32>,
    %c0_37 = arith.constant 0 : index
    %c0_38 = arith.constant 0 : index
    %63 = vector.load %arg16[%c0_37, %c0_38] : memref<8x256xf32, #tpu.memory_space<vmem>>, vector<8x256xf32>
    %64 = arith.truncf %63 : vector<8x256xf32> to vector<8x256xbf16>
    %c0_39 = arith.constant 0 : index
    %c0_40 = arith.constant 0 : index
    %65 = vector.load %arg11[%c0_39, %c0_40] : memref<32x8xbf16, #tpu.memory_space<vmem>>, vector<32x8xbf16>
    %cst_41 = arith.constant dense<0.000000e+00> : vector<32x256xf32>
    %66 = tpu.matmul %65, %64, %cst_41 {dimension_numbers = #tpu.dot_dimension_numbers<[1], [0], [0], [1], [0, 0, 1, 1], [], []>} : vector<32x8xbf16>, vector<8x256xbf16>, vector<32x256xf32> -> vector<32x256xf32>
    %c0_42 = arith.constant 0 : index
    %c0_43 = arith.constant 0 : index
    %67 = vector.load %arg12[%c0_42, %c0_43] : memref<32x1xf32, #tpu.memory_space<vmem>>, vector<32x1xf32>
    %68 = vector.broadcast %67 : vector<32x1xf32> to vector<32x256xf32>
    %69 = arith.addf %66, %68 : vector<32x256xf32>
    %cst_44 = arith.constant 0.000000e+00 : f32
    %70 = vector.broadcast %cst_44 : f32 to vector<32x256xf32>
    %71 = arith.maximumf %69, %70 : vector<32x256xf32>
    %c0_45 = arith.constant 0 : index
    %c0_46 = arith.constant 0 : index
    %72 = vector.load %arg13[%c0_45, %c0_46] : memref<1x32xbf16, #tpu.memory_space<vmem>>, vector<1x32xbf16>
    %73 = arith.truncf %71 : vector<32x256xf32> to vector<32x256xbf16>
    %cst_47 = arith.constant dense<0.000000e+00> : vector<1x256xf32>
    %74 = tpu.matmul %72, %73, %cst_47 {dimension_numbers = #tpu.dot_dimension_numbers<[1], [0], [0], [1], [0, 0, 1, 1], [], []>} : vector<1x32xbf16>, vector<32x256xbf16>, vector<1x256xf32> -> vector<1x256xf32>
    %c0_48 = arith.constant 0 : index
    %c0_49 = arith.constant 0 : index
    %75 = vector.load %arg14[%c0_48, %c0_49] : memref<1x1xf32, #tpu.memory_space<vmem>>, vector<1x1xf32>
    %76 = vector.broadcast %75 : vector<1x1xf32> to vector<1x256xf32>
    %77 = arith.addf %74, %76 : vector<1x256xf32>
    %cst_50 = arith.constant 0.000000e+00 : f32
    %78 = vector.broadcast %cst_50 : f32 to vector<1x256xf32>
    %79 = arith.maximumf %77, %78 : vector<1x256xf32>
    %80 = math.absf %77 : vector<1x256xf32>
    %cst_51 = arith.constant 0.000000e+00 : f32
    %81 = vector.broadcast %cst_51 : f32 to vector<1x256xf32>
    %82 = arith.subf %81, %80 : vector<1x256xf32>
    %83 = math.exp %82 : vector<1x256xf32>
    %cst_52 = arith.constant 1.000000e+00 : f32
    %84 = vector.broadcast %cst_52 : f32 to vector<1x256xf32>
    %85 = arith.addf %84, %83 : vector<1x256xf32>
    %86 = math.log %85 : vector<1x256xf32>
    %87 = arith.addf %79, %86 : vector<1x256xf32>
    %cst_53 = arith.constant 0.000000e+00 : f32
    %88 = vector.broadcast %cst_53 : f32 to vector<1x256xf32>
    %89 = arith.cmpf ogt, %87, %88 : vector<1x256xf32>
    %90 = tpu.reciprocal %87 {approx = true} : vector<1x256xf32> -> vector<1x256xf32>
    %cst_54 = arith.constant 0.000000e+00 : f32
    %91 = vector.broadcast %cst_54 : f32 to vector<1x256xf32>
    %92 = arith.select %89, %90, %91 : vector<1x256xi1>, vector<1x256xf32>
    %93 = vector.broadcast %3 : f32 to vector<1x256xf32>
    %94 = arith.mulf %92, %93 : vector<1x256xf32>
    %95 = vector.broadcast %1 : f32 to vector<1x256xf32>
    %96 = arith.addf %94, %95 : vector<1x256xf32>
    %c0_55 = arith.constant 0 : index
    %c0_56 = arith.constant 0 : index
    %c0_57 = arith.constant 0 : index
    %97 = vector.load %arg15[%c0_55, %c0_56, %c0_57] : memref<1x1x256xf32, #tpu.memory_space<vmem>>, vector<1x1x256xf32>
    %98 = vector.shape_cast %97 : vector<1x1x256xf32> to vector<1x256xf32>
    %99 = vector.shape_cast %96 : vector<1x256xf32> to vector<1x1x256xf32>
    tpu.vector_store %arg15[%c0_55, %c0_56, %c0_57], %99 {strides = array<i32>} : memref<1x1x256xf32, #tpu.memory_space<vmem>>, vector<1x1x256xf32>,
    return
  }
  func.func @transform_0(%arg0: i32, %arg1: i32) -> i32 {
    %c0_i32 = arith.constant 0 : i32
    %c0_i32_0 = arith.constant 0 : i32
    return %c0_i32 : i32
  }
  func.func @transform_1(%arg0: i32, %arg1: i32) -> i32 {
    %c0_i32 = arith.constant 0 : i32
    %c0_i32_0 = arith.constant 0 : i32
    return %c0_i32 : i32
  }
  func.func @transform_2(%arg0: i32, %arg1: i32) -> i32 {
    %c0_i32 = arith.constant 0 : i32
    %c0_i32_0 = arith.constant 0 : i32
    return %c0_i32 : i32
  }
  func.func @transform_3(%arg0: i32, %arg1: i32) -> (i32, i32, i32) {
    %c0_i32 = arith.constant 0 : i32
    %c0_i32_0 = arith.constant 0 : i32
    return %arg0, %c0_i32, %arg1 : i32, i32, i32
  }
  func.func @transform_4(%arg0: i32, %arg1: i32) -> (i32, i32, i32) {
    %c0_i32 = arith.constant 0 : i32
    %c0_i32_0 = arith.constant 0 : i32
    return %arg0, %c0_i32, %arg1 : i32, i32, i32
  }
  func.func @transform_5(%arg0: i32, %arg1: i32) -> (i32, i32) {
    %c0_i32 = arith.constant 0 : i32
    %c0_i32_0 = arith.constant 0 : i32
    %c0_i32_1 = arith.constant 0 : i32
    return %c0_i32, %c0_i32_0 : i32, i32
  }
  func.func @transform_6(%arg0: i32, %arg1: i32) -> (i32, i32) {
    %c0_i32 = arith.constant 0 : i32
    %c0_i32_0 = arith.constant 0 : i32
    %c0_i32_1 = arith.constant 0 : i32
    return %c0_i32, %c0_i32_0 : i32, i32
  }
  func.func @transform_7(%arg0: i32, %arg1: i32) -> (i32, i32) {
    %c0_i32 = arith.constant 0 : i32
    %c0_i32_0 = arith.constant 0 : i32
    %c0_i32_1 = arith.constant 0 : i32
    return %c0_i32, %c0_i32_0 : i32, i32
  }
  func.func @transform_8(%arg0: i32, %arg1: i32) -> (i32, i32) {
    %c0_i32 = arith.constant 0 : i32
    %c0_i32_0 = arith.constant 0 : i32
    %c0_i32_1 = arith.constant 0 : i32
    return %c0_i32, %c0_i32_0 : i32, i32
  }
  func.func @transform_9(%arg0: i32, %arg1: i32) -> (i32, i32) {
    %c0_i32 = arith.constant 0 : i32
    %c0_i32_0 = arith.constant 0 : i32
    %c0_i32_1 = arith.constant 0 : i32
    return %c0_i32, %c0_i32_0 : i32, i32
  }
  func.func @transform_10(%arg0: i32, %arg1: i32) -> (i32, i32) {
    %c0_i32 = arith.constant 0 : i32
    %c0_i32_0 = arith.constant 0 : i32
    %c0_i32_1 = arith.constant 0 : i32
    return %c0_i32, %c0_i32_0 : i32, i32
  }
  func.func @transform_11(%arg0: i32, %arg1: i32) -> (i32, i32) {
    %c0_i32 = arith.constant 0 : i32
    %c0_i32_0 = arith.constant 0 : i32
    %c0_i32_1 = arith.constant 0 : i32
    return %c0_i32, %c0_i32_0 : i32, i32
  }
  func.func @transform_12(%arg0: i32, %arg1: i32) -> (i32, i32) {
    %c0_i32 = arith.constant 0 : i32
    %c0_i32_0 = arith.constant 0 : i32
    %c0_i32_1 = arith.constant 0 : i32
    return %c0_i32, %c0_i32_0 : i32, i32
  }
  func.func @transform_13(%arg0: i32, %arg1: i32) -> (i32, i32, i32) {
    %c0_i32 = arith.constant 0 : i32
    %c0_i32_0 = arith.constant 0 : i32
    return %arg0, %c0_i32, %arg1 : i32, i32, i32
  }
}

</mosaic_0001>

<bundles_post_ra>
// kernel: priorda_forward.2
= control target key start
LH: loop header
LB: loop body
LE: loop exit
PB: predicated region body
PF: predicated region fallthrough
CT: control target
= control target key end

     0   :  { %s381_s9 = smov 0   ;;  %s383_s10 = smov 0   ;;  %s428_s0 = inlined_call_operand.vmem [shape: f32[2,8,32], index: 0, kind: input, shape index: {}]   ;;  %s429_s1 = inlined_call_operand.vmem [shape: f32[2,1,1], index: 1, kind: output, shape index: {0}]   ;;  %s430_s2 = inlined_call_operand.vmem [shape: f32[2,1,1], index: 2, kind: output, shape index: {1}]  }
   0x1   :  { %s385_s11 = smov 0  }
   0x2 LB: > { %s25_s12 = sadd.s32 1, %s358_s10  ;;  %p310_p0 = scmp.ge.s32.totalorder %s362_s11, 1  ;;  %s362_s11 = sphi %s385_s11, %s13_s11   ;;  %s358_s10 = sphi %s383_s10, %s432_s10   ;;  %s354_s9 = sphi %s381_s9, %s431_s9  }
   0x3   : > { %p27_p1 = scmp.ge.s32.totalorder %s25_s12, 2  ;;  %p131_p2 = scmp.lt.s32.totalorder %s362_s11, 3 }
   0x5   : > { %s434_s12 = smov (%p27_p1, %s25_s12), 0  ;;  %p132_p3 = pnand %p310_p0, %p131_p2 }
   0x6   : > { %p156_p4 = scmp.lt.s32.totalorder (!%p132_p3), %s354_s9, 1 }
   0x7   : > { %135 = sbr.rel (%p132_p3) target bundleno = 173 (0xad), region = 24 }
   0xc   : > { %vm173_vm0 = vcmask 261120   ;;  %v177_v0 = vlaneseq  ;;  %v364_v1 = vmov inf   ;;  %s436_s9 = smov (!%p156_p4, %s354_s9), 1  ;;  %v365_v2 = vmov -inf  }
   0xd   : > { %174 = vst.msk [vmem:[#allocation2] sm:$0xff] %vm173_vm0, %v364_v1  ;;  %s311_s13 = sshll.u32 %s436_s9, 3  ;;  %s165_s19 = scalar_lea.vmem %s429_s1, %s436_s9  ;;  %vm220_vm4 = vcmask 0  }
   0xe   : > { %175 = vst.msk [vmem:[#allocation3] sm:$0xff] %vm173_vm0, %v365_v2  ;;  %v178_v3 = vand.u32 127, %v177_v0  ;;  %s162_s16 = scalar_lea.vmem %s428_s0, %s311_s13  ;;  %s168_s22 = scalar_lea.vmem %s430_s2, %s436_s9 }
   0xf   : > { %v176_v4 = vld [vmem:[%s162_s16] sm:$0xff] }
  0x10   : > { %vm183_vm1 = vcmp.lt.s32.totalorder %v178_v3, 32  ;;  %vm182_vm2 = vcmp.gt.f32.partialorder %v176_v4, 0.0 }
  0x11   : > { %vm184_vm3 = vmand %vm182_vm2, %vm183_vm1 }
  0x12   : > { %v186_v6 = vsel %vm184_vm3, %v176_v4, inf  ;;  %v191_v8 = vsel %vm184_vm3, %v176_v4, -inf }
  0x14   : > { %v185_v5 = vld [vmem:[#allocation2] sm:$0xff] }
  0x15   : > { %v190_v7 = vld [vmem:[#allocation3] sm:$0xff]  ;;  %v187_v9 = vmin.f32 %v185_v5, %v186_v6 }
  0x16   : > { %v192_v10 = vmax.f32 %v190_v7, %v191_v8 }
  0x17   : > { %189 = vst.msk [vmem:[#allocation2] sm:$0xff] %vm173_vm0, %v187_v9 }
  0x18   : > { %193 = vst.msk [vmem:[#allocation3] sm:$0xff] %vm173_vm0, %v192_v10 }
  0x1e   : > { %v197_v11 = vld [vmem:[#allocation2] sm:$0xff] }
  0x1f   : > { %v198_v12 = vsel %vm173_vm0, %v197_v11, inf  ;;  %v207_v13 = vld [vmem:[#allocation3] sm:$0xff] }
  0x20   : > { %199 = vmin.xlane.f32.xlu0 %v198_v12  ;;  %v208_v14 = vsel %vm173_vm0, %v207_v13, -inf }
  0x28   : > { %209 = vmax.xlane.f32.xlu0 %v208_v14 }
  0x93   : > { %v200_v15 = vpop.xlane.xlu0 %199 }
  0x94   : > { %v201_v16 = vrot.slane %v200_v15, 4 }
  0x96   : > { %v202_v17 = vmin.f32 %v200_v15, %v201_v16 }
  0x98   : > { %v203_v18 = vrot.slane %v202_v17, 2 }
  0x9a   : > { %v204_v19 = vmin.f32 %v202_v17, %v203_v18 }
  0x9b   : > { %v210_v20 = vpop.xlane.xlu0 %209 }
  0x9c   : > { %v205_v21 = vrot.slane %v204_v19, 1  ;;  %v211_v22 = vrot.slane %v210_v20, 4 }
  0x9e   : > { %v206_v23 = vmin.f32 %v204_v19, %v205_v21  ;;  %v212_v24 = vmax.f32 %v210_v20, %v211_v22 }
  0xa0   : > { %221 = vst.msk [vmem:[%s165_s19] sm:$0x1] %vm220_vm4, %v206_v23  ;;  %v213_v25 = vrot.slane %v212_v24, 2 }
  0xa2   : > { %v214_v26 = vmax.f32 %v212_v24, %v213_v25 }
  0xa4   : > { %v215_v27 = vrot.slane %v214_v26, 1 }
  0xa6   : > { %v216_v28 = vmax.f32 %v214_v26, %v215_v27 }
  0xa8   : > { %v217_v29 = vsub.f32 %v216_v28, %v206_v23 }
  0xaa   : > { %vm218_vm5 = vcmp.eq.f32.partialorder %v217_v29, 0.0 }
  0xab   : > { %v219_v30 = vsel %vm218_vm5, 1.0, %v217_v29 }
  0xac   : > { %222 = vst.msk [vmem:[%s168_s22] sm:$0x1] %vm220_vm4, %v219_v30 }
  0xad PF: > { %s13_s11 = sadd.s32 1, %s362_s11   ;;  %s431_s9 = smov %s358_s10 }
  0xae   : > { %p10_p5 = scmp.ge.s32.totalorder %s13_s11, 4   ;;  %s432_s10 = smov %s434_s12 }
  0xb0   :  { %12 = sbr.rel (!%p10_p5) target bundleno = 2 (0x2), region = 74 }

// kernel: priorda_forward.3
= control target key start
LH: loop header
LB: loop body
LE: loop exit
PB: predicated region body
PF: predicated region fallthrough
CT: control target
= control target key end

     0   :  { %s1535_s0 = inlined_call_operand.vmem [shape: f32[2], index: 0, kind: input, shape index: {}]   ;;  %s1536_s1 = inlined_call_operand.vmem [shape: f32[2], index: 1, kind: input, shape index: {}]   ;;  %s1537_s2 = inlined_call_operand.vmem [shape: f32[2], index: 2, kind: input, shape index: {}]   ;;  %s1538_s3 = inlined_call_operand.vmem [shape: f32[2,3,256], index: 3, kind: input, shape index: {}]   ;;  %s1539_s4 = inlined_call_operand.vmem [shape: f32[2,1,256], index: 4, kind: input, shape index: {}]   ;;  %s1540_s5 = inlined_call_operand.vmem [shape: bf16[32,8], index: 5, kind: input, shape index: {}]   ;;  %s1541_s6 = inlined_call_operand.vmem [shape: f32[32,1], index: 6, kind: input, shape index: {}]   ;;  %s1542_s7 = inlined_call_operand.vmem [shape: bf16[3,32], index: 7, kind: input, shape index: {}]   ;;  %s1543_s8 = inlined_call_operand.vmem [shape: f32[3,1], index: 8, kind: input, shape index: {}]   ;;  %s1544_s9 = inlined_call_operand.vmem [shape: bf16[32,8], index: 9, kind: input, shape index: {}]   ;;  %s1545_s10 = inlined_call_operand.vmem [shape: f32[32,1], index: 10, kind: input, shape index: {}]   ;;  %s1546_s11 = inlined_call_operand.vmem [shape: bf16[1,32], index: 11, kind: input, shape index: {}]   ;;  %s1547_s12 = inlined_call_operand.<no memory space> [shape: f32[1,1], index: 12, kind: input, shape index: {}]   ;;  %s1548_s13 = inlined_call_operand.vmem [shape: f32[2,1,256], index: 13, kind: output, shape index: {}]  }
   0x1   :  { %v18_v0 = vstv %s1547_s12 }
   0x2   :  { %19 = vst [vmem:[#allocation3] sm:$0x1] %v18_v0 }
   0x3   :  { %20 = vsyncpa [#allocation5], 0 }
   0x4   :  { %21 = vsyncpa [#allocation7], 0  ;;  %s1373_s27 = smov 0   ;;  %s1375_s28 = smov 0  }
   0x5   :  { %s1377_s29 = smov 0  }
   0x6 LB: > { %s381_s14 = sshll.u32 %s1536_s1, 4  ;;  %s1080_s15 = sadd.s32 4294967295, %s1293_s29   ;;  %s1293_s29 = sphi %s1377_s29, %s27_s29   ;;  %s1289_s28 = sphi %s1375_s28, %s1554_s28   ;;  %s1285_s27 = sphi %s1373_s27, %s1553_s27   ;;  %s382_s14 = int_to_ptr.vmem [resolvable:$true] %s381_s14 }
   0x7   : > { %p1082_p0 = scmp.ge.s32.totalorder %s1293_s29, 1  ;;  %p359_p1 = scmp.lt.s32.totalorder %s1293_s29, 3 }
   0x8   : > { %p1394_p2 = scmp.eq.s32.totalorder %s1080_s15, 0  ;;  %s39_s18 = sadd.s32 1, %s1289_s28 }
   0x9   : > { %p1398_p3 = pnand %p1082_p0, %p359_p1  ;;  %s371_s21 = sshll.u32 %s1535_s0, 4  ;;  %s372_s21 = int_to_ptr.vmem [resolvable:$true] %s371_s21 }
   0xa   : > { %p41_p6 = scmp.ge.s32.totalorder %s39_s18, 2  ;;  %s391_s24 = sshll.u32 %s1537_s2, 4  ;;  %s392_s24 = int_to_ptr.vmem [resolvable:$true] %s391_s24 }
   0xb   : > { %p1142_p4 = pneg %p1398_p3  ;;  %s1295_s25 = smov [#allocation6]  }
   0xc   : > { %s1556_s18 = smov (%p41_p6, %s39_s18), 0  ;;  %s1296_s26 = smov [#allocation4]  }
   0xd   : > { %p1143_p5 = pnand %p1394_p2, %p1142_p4  ;;  %s1297_s12 = smov [#allocation8]  }
   0xe   : > { %453 = sbr.rel (%p1398_p3) target bundleno = 752 (0x2f0), region = 72 }
   0xf   : > { %1148 = dma.vmem_to_smem (!%p1143_p5), %s382_s14, 16, %s1295_s25, [#allocation7]  }
  0x10   : > { %1145 = dma.vmem_to_smem (!%p1143_p5), %s372_s21, 16, %s1296_s26, [#allocation5]  }
  0x11   : > { %1151 = dma.vmem_to_smem (!%p1143_p5), %s392_s24, 16, %s1297_s12, [#allocation7]  }
  0x13   : > { %1276 = dma.done.wait (%p1394_p2), [#allocation5], 16  }
  0x14   : > { %1278 = vsyncadd (%p1394_p2), [#allocation5], 4294967280 }
  0x15   : > { %1280 = dma.done.wait (%p1394_p2), [#allocation7], 32  }
  0x16   : > { %1282 = vsyncadd (%p1394_p2), [#allocation7], 4294967264 }
  0x17   : > { %470 = sfence }
  0x18   : > { %p525_p7 = scmp.lt.s32.totalorder %s1285_s27, 1  ;;  %v590_v1 = vld [vmem:[%s1541_s6 + $0x10] sm:$0xff]  ;;  %v566_v2 = vlaneseq  ;;  %v1298_v3 = vmov 0.0   ;;  %v588_v4 = vld [vmem:[%s1541_s6] sm:$0xff]  ;;  %v1299_v5 = vmov 0   ;;  %v591_v10 = vld [vmem:[%s1541_s6 + $0x18] sm:$0xff] }
  0x19   : > { %578 = vst [vmem:[#allocation2] sm:$0xe0] %v1298_v3  ;;  %1187 = vset.pattern.permute.xlu0 %v1299_v5  ;;  %1188 = vset.pattern.permute.xlu1 %v1299_v5  ;;  %v589_v13 = vld [vmem:[%s1541_s6 + $0x8] sm:$0xff]  ;;  %v787_v14 = vld [vmem:[%s1545_s10 + $0x18] sm:$0xff]  ;;  %v784_v15 = vld [vmem:[%s1545_s10] sm:$0xff]  ;;  %vm629_vm2 = vcmask 1043456  }
  0x1a   : > { %s1433_s19 = scalar_select %p525_p7, %s1285_s27, 1  ;;  %579 = vst [vmem:[#allocation2 + $0x8] sm:$0xe0] %v1298_v3  ;;  %604 = vperm.xlu0 %1187, %v590_v1   ;;  %594 = vperm.xlu1 %1188, %v588_v4   ;;  %vm1445_vm0 = vcmp.lt.s32.totalorder %v566_v2, 256  ;;  %v881_v20 = vld [vmem:[#allocation3] sm:$0x1] }
  0x1b   : > { %1189 = vset.pattern.permute.xlu2 %v1299_v5  ;;  %v1126_v22 = vld [vmem:[%s1540_s5] sm:$0xff]  ;;  %vm622_vm3 = vcmask 64512   ;;  %v1127_v24 = vld [vmem:[%s1540_s5 + $0x8] sm:$0xff]  ;;  %v786_v31 = vld [vmem:[%s1545_s10 + $0x10] sm:$0xff]  ;;  %vm693_vm4 = vcmask 261120   ;;  %s555_s24 = sld [smem:[#allocation8 + %s1285_s27]] }
  0x1c   : > { %s1125_s16 = sshll.u32 %s1433_s19, 3  ;;  %s1093_s20 = sshll.u32 %s1433_s19, 1  ;;  %v687_v27 = vld [vmem:[%s1543_s8] sm:$0x7]  ;;  %v785_v35 = vld [vmem:[%s1545_s10 + $0x8] sm:$0xff]  ;;  %vm949_vm11 = vcmask 1040384  }
  0x1d   : > { %s532_s23 = scalar_lea.vmem %s1538_s3, %s1125_s16  ;;  %s541_s26 = scalar_lea.vmem %s1539_s4, %s1093_s20  ;;  %690 = vperm.xlu2 %1189, %v687_v27   ;;  %v682_v60 = vld [vmem:[%s1542_s7] sm:$0x3] }
  0x1e   : > { %v556_v7 = vld [vmem:[%s532_s23] sm:$0x77]  ;;  %s553_s23 = sld [smem:[#allocation4 + %s1285_s27]]  ;;  %s550_s21 = scalar_lea.vmem %s1548_s13, %s1093_s20 }
  0x1f   : > { %v557_v8 = vld [vmem:[%s541_s26] sm:$0x3]  ;;  %559 = vst [vmem:[#allocation1] ss:$2 sm:$0xff] %v556_v7  ;;  %s554_s17 = sld [smem:[#allocation6 + %s1285_s27]] }
  0x20   : > { %vm573_vm1 = vcmp.gt.f32.partialorder %v557_v8, 0.0  ;;  %571 = vst.msk [vmem:[#allocation2 + $0x3] ss:$8 sm:$0x3] %vm1445_vm0, %v557_v8 }
  0x21   : > { %v574_v9 = vsel %vm573_vm1, 1.0, %v1298_v3  ;;  %v750_v27 = vstv %s555_s24 }
  0x22   : > { %576 = vst.msk [vmem:[#allocation2 + $0x4] ss:$8 sm:$0x3] %vm1445_vm0, %v574_v9  ;;  %609 = vperm.xlu0 %1187, %v591_v10   ;;  %599 = vperm.xlu1 %1188, %v589_v13  }
  0x25   : > { %800 = vperm.xlu2 %1189, %v786_v31  }
  0x26   : > { %v560_v11 = vld.sshfl [vmem:[#allocation1] sm:$0xff pattern:$0x75316420]  ;;  %v561_v12 = vld.sshfl [vmem:[#allocation1 + $0x8] sm:$0xff pattern:$0x75316420] }
  0x27   : > { %564 = vst [vmem:[#allocation2] sm:$0x7] %v560_v11 }
  0x28   : > { %565 = vst [vmem:[#allocation2 + $0x8] sm:$0x7] %v561_v12 }
  0x2a   : > { %805 = vperm.xlu0 %1187, %v787_v14   ;;  %790 = vperm.xlu1 %1188, %v784_v15  }
  0x2d   : > { %795 = vperm.xlu2 %1189, %v785_v35  }
  0x2e   : > { %v580_v16 = vld [vmem:[#allocation2] sm:$0xff] }
  0x2f   : > { %v582_v17 = vpack.c.bf16 %v580_v16, %v580_v16  ;;  %v581_v18 = vld [vmem:[#allocation2 + $0x8] sm:$0xff] }
  0x30   : > { %v583_v19 = vpack.c.bf16 %v581_v18, %v581_v18 }
  0x31   : > { %v631_v21 = vsel %vm629_vm2, %v582_v17, 0 }
  0x32   : > { %643 = vmatpush.bf16.msra.mxu0 %v631_v21  ;;  %v634_v23 = vsel %vm629_vm2, %v583_v19, 0  ;;  %884 = vperm.xlu0 %1187, %v881_v20  }
  0x33   : > { %662 = vmatpush.bf16.msra.mxu1 %v634_v23  ;;  %v1493_v23 = vstv %s553_s23 }
  0x35   : > { %1103 = vmatmul.msk.bf16.vlgmr.msra.gmra.mxu0 %vm622_vm3, %v1126_v22 }
  0x36   : > { %1105 = vmatmul.msk.bf16.vlgmr.msra.gmra.mxu1 %vm622_vm3, %v1126_v22 }
  0x45   : > { %1104 = vmatmul.msk.bf16.gmra.mxu0 %vm622_vm3, %v1127_v24 }
  0x46   : > { %1106 = vmatmul.msk.bf16.gmra.mxu1 %vm622_vm3, %v1127_v24 }
  0x77   : > { %v691_v61 = vpop.permute.xlu2 %690 }
  0x8c   : > { %v595_v30 = vpop.permute.xlu1 %594  ;;  %v605_v32 = vpop.permute.xlu0 %604 }
  0x94   : > { %v600_v36 = vpop.permute.xlu1 %599  ;;  %v610_v38 = vpop.permute.xlu0 %609 }
  0xb2   : > { %v645_v25 = vpop.f32.mrf.mxu0 }
  0xb3   : > { %v664_v26 = vpop.f32.mrf.mxu1  ;;  %v646_v46 = vadd.f32 %v645_v25, %v595_v30 }
  0xb4   : > { %v665_v49 = vadd.f32 %v664_v26, %v595_v30 }
  0xb5   : > { %v674_v56 = vmax.f32 %v646_v46, 0.0 }
  0xb6   : > { %v675_v57 = vmax.f32 %v665_v49, 0.0 }
  0xba   : > { %v647_v28 = vpop.f32.mrf.mxu0 }
  0xbb   : > { %v666_v29 = vpop.f32.mrf.mxu1  ;;  %v648_v41 = vadd.f32 %v647_v28, %v600_v36 }
  0xbc   : > { %v667_v44 = vadd.f32 %v666_v29, %v600_v36 }
  0xbd   : > { %v676_v52 = vmax.f32 %v648_v41, 0.0 }
  0xbe   : > { %v677_v54 = vmax.f32 %v667_v44, 0.0 }
  0xbf   : > { %v683_v58 = vpack.c.bf16 %v676_v52, %v674_v56  ;;  %v801_v52 = vpop.permute.xlu2 %800 }
  0xc0   : > { %v684_v59 = vpack.c.bf16 %v677_v54, %v675_v57 }
  0xc2   : > { %v650_v33 = vpop.f32.mrf.mxu0 }
  0xc3   : > { %v669_v34 = vpop.f32.mrf.mxu1  ;;  %v651_v37 = vadd.f32 %v650_v33, %v605_v32 }
  0xc4   : > { %v670_v39 = vadd.f32 %v669_v34, %v605_v32 }
  0xc5   : > { %v678_v47 = vmax.f32 %v651_v37, 0.0 }
  0xc6   : > { %v679_v50 = vmax.f32 %v670_v39, 0.0 }
  0xc7   : > { %v796_v57 = vpop.permute.xlu2 %795 }
  0xca   : > { %v652_v40 = vpop.f32.mrf.mxu0 }
  0xcb   : > { %v653_v42 = vadd.f32 %v652_v40, %v610_v38  ;;  %v671_v43 = vpop.f32.mrf.mxu1 }
  0xcc   : > { %v672_v45 = vadd.f32 %v671_v43, %v610_v38 }
  0xcd   : > { %v680_v48 = vmax.f32 %v653_v42, 0.0 }
  0xce   : > { %v681_v51 = vmax.f32 %v672_v45, 0.0  ;;  %v1128_v45 = vld [vmem:[%s1544_s9] sm:$0xff] }
  0xcf   : > { %v685_v53 = vpack.c.bf16 %v680_v48, %v678_v47  ;;  %v1129_v47 = vld [vmem:[%s1544_s9 + $0x8] sm:$0xff] }
  0xd0   : > { %v686_v55 = vpack.c.bf16 %v681_v51, %v679_v50 }
  0xd1   : > { %703 = vmatpush.bf16.msra.mxu2 %v685_v53 }
  0xd2   : > { %716 = vmatpush.bf16.msra.mxu3 %v686_v55  ;;  %v806_v55 = vpop.permute.xlu0 %805 }
  0xd5   : > { %704 = vmatpush.bf16.msra.mxu2 %v683_v58 }
  0xd6   : > { %717 = vmatpush.bf16.msra.mxu3 %v684_v59 }
  0xd8   : > { %1107 = vmatmul.msk.bf16.vlgmr.msra.gmra.mxu2 %vm693_vm4, %v682_v60 }
  0xd9   : > { %1108 = vmatmul.msk.bf16.vlgmr.msra.gmra.mxu3 %vm693_vm4, %v682_v60 }
 0x15b   : > { %v706_v62 = vpop.f32.mrf.mxu2 }
 0x15c   : > { %v707_v63 = vadd.f32 %v706_v62, %v691_v61  ;;  %v719_v0 = vpop.f32.mrf.mxu3 }
 0x15d   : > { %v720_v1 = vadd.f32 %v719_v0, %v691_v61 }
 0x15e   : > { %v725_v2 = vand.u32 2147483647, %v707_v63  ;;  %v723_v17 = vmax.f32 %v707_v63, 0.0  ;;  %v791_v63 = vpop.permute.xlu1 %790 }
 0x15f   : > { %v726_v3 = vand.u32 2147483647, %v720_v1  ;;  %v724_v19 = vmax.f32 %v720_v1, 0.0 }
 0x160   : > { %v727_v4 = vsub.f32 0.0, %v725_v2 }
 0x161   : > { %v728_v5 = vsub.f32 0.0, %v726_v3 }
 0x162   : > { %v729_v7 = vmul.f32 1.442695, %v727_v4 }
 0x163   : > { %v731_v8 = vmul.f32 1.442695, %v728_v5  ;;  %v708_v9 = vpop.f32.mrf.mxu2 }
 0x164   : > { %1190 = vpow2.f32 %v729_v7  ;;  %v721_v10 = vpop.f32.mrf.mxu3 }
 0x165   : > { %1192 = vpow2.f32 %v731_v8 }
 0x16a   : > { %v1191_v11 = vpop.eup %1190 }
 0x16b   : > { %v1193_v12 = vpop.eup %1192  ;;  %v733_v13 = vadd.f32 1.0, %v1191_v11 }
 0x16c   : > { %v734_v14 = vadd.f32 1.0, %v1193_v12 }
 0x16d   : > { %1194 = vlog2.f32 %v733_v13 }
 0x16e   : > { %1196 = vlog2.f32 %v734_v14 }
 0x173   : > { %v1195_v15 = vpop.eup %1194 }
 0x174   : > { %v1197_v16 = vpop.eup %1196  ;;  %v736_v18 = vmul.f32 0.6931472, %v1195_v15 }
 0x175   : > { %v738_v20 = vmul.f32 0.6931472, %v1197_v16 }
 0x176   : > { %v739_v21 = vadd.f32 %v736_v18, %v723_v17  ;;  %v876_v17 = vld [vmem:[%s1546_s11] sm:$0x1]  ;;  %v885_v18 = vpop.permute.xlu0 %884 }
 0x177   : > { %v740_v22 = vadd.f32 %v738_v20, %v724_v19  ;;  %v887_v19 = vperm.slane %v885_v18, 0 }
 0x178   : > { %1198 = vrcp.f32 %v739_v21  ;;  %761 = vst [vmem:[#allocation1] sm:$0xff] %v739_v21  ;;  %vm741_vm5 = vcmp.gt.f32.partialorder %v739_v21, 0.0 }
 0x179   : > { %1200 = vrcp.f32 %v740_v22  ;;  %762 = vst [vmem:[#allocation1 + $0x9] sm:$0xff] %v740_v22  ;;  %vm742_vm6 = vcmp.gt.f32.partialorder %v740_v22, 0.0 }
 0x17e   : > { %v1199_v24 = vpop.eup %1198 }
 0x17f   : > { %v1201_v25 = vpop.eup %1200  ;;  %v745_v26 = vsel %vm741_vm5, %v1199_v24, 0.0 }
 0x180   : > { %v748_v28 = vsub.f32 %v745_v26, %v1493_v23  ;;  %v746_v29 = vsel %vm742_vm6, %v1201_v25, 0.0  ;;  %v764_v30 = vld [vmem:[#allocation1 + $0x2] ss:$9 sm:$0xff] }
 0x181   : > { %v749_v31 = vsub.f32 %v746_v29, %v1493_v23  ;;  %766 = vst.msk [vmem:[#allocation2 + $0x3] ss:$8 sm:$0x3] %vm1445_vm0, %v764_v30 }
 0x182   : > { %v751_v32 = vmul.f32 %v750_v27, %v748_v28 }
 0x183   : > { %v752_v33 = vmul.f32 %v750_v27, %v749_v31 }
 0x184   : > { %1202 = vrcp.f32 %v751_v32  ;;  %vm753_vm7 = vcmp.gt.f32.partialorder %v751_v32, 0.0 }
 0x185   : > { %1204 = vrcp.f32 %v752_v33  ;;  %vm754_vm8 = vcmp.gt.f32.partialorder %v752_v33, 0.0 }
 0x18a   : > { %v1203_v34 = vpop.eup %1202 }
 0x18b   : > { %v1205_v35 = vpop.eup %1204  ;;  %v757_v36 = vsel %vm753_vm7, %v1203_v34, 0.0 }
 0x18c   : > { %v770_v37 = vrot.slane %v757_v36, 4  ;;  %v758_v38 = vsel %vm754_vm8, %v1205_v35, 0.0 }
 0x18d   : > { %v771_v39 = vrot.slane %v758_v38, 4 }
 0x18e   : > { %774 = vst [vmem:[#allocation2] sm:$0x30] %v770_v37 }
 0x18f   : > { %775 = vst [vmem:[#allocation2 + $0x8] sm:$0x30] %v771_v39 }
 0x195   : > { %v776_v40 = vld [vmem:[#allocation2] sm:$0xff] }
 0x196   : > { %v778_v41 = vpack.c.bf16 %v776_v40, %v776_v40  ;;  %v777_v42 = vld [vmem:[#allocation2 + $0x8] sm:$0xff] }
 0x197   : > { %v779_v43 = vpack.c.bf16 %v777_v42, %v777_v42 }
 0x198   : > { %v825_v44 = vsel %vm629_vm2, %v778_v41, 0 }
 0x199   : > { %837 = vmatpush.bf16.msrb.mxu2 %v825_v44  ;;  %v828_v46 = vsel %vm629_vm2, %v779_v43, 0 }
 0x19a   : > { %856 = vmatpush.bf16.msrb.mxu3 %v828_v46  ;;  %v941_v46 = vstv %s554_s17 }
 0x19c   : > { %1117 = vmatmul.msk.bf16.vlgmr.msrb.gmra.mxu2 %vm622_vm3, %v1128_v45 }
 0x19d   : > { %1119 = vmatmul.msk.bf16.vlgmr.msrb.gmra.mxu3 %vm622_vm3, %v1128_v45 }
 0x1ac   : > { %1118 = vmatmul.msk.bf16.gmra.mxu2 %vm622_vm3, %v1129_v47 }
 0x1ad   : > { %1120 = vmatmul.msk.bf16.gmra.mxu3 %vm622_vm3, %v1129_v47 }
 0x21f   : > { %v839_v48 = vpop.f32.mrf.mxu2 }
 0x220   : > { %v858_v49 = vpop.f32.mrf.mxu3  ;;  %v840_v2 = vadd.f32 %v839_v48, %v791_v63 }
 0x221   : > { %v859_v5 = vadd.f32 %v858_v49, %v791_v63 }
 0x222   : > { %v868_v13 = vmax.f32 %v840_v2, 0.0 }
 0x223   : > { %v869_v14 = vmax.f32 %v859_v5, 0.0 }
 0x227   : > { %v841_v50 = vpop.f32.mrf.mxu2 }
 0x228   : > { %v860_v51 = vpop.f32.mrf.mxu3  ;;  %v842_v60 = vadd.f32 %v841_v50, %v796_v57 }
 0x229   : > { %v861_v0 = vadd.f32 %v860_v51, %v796_v57 }
 0x22a   : > { %v870_v9 = vmax.f32 %v842_v60, 0.0 }
 0x22b   : > { %v871_v11 = vmax.f32 %v861_v0, 0.0 }
 0x22c   : > { %v877_v15 = vpack.c.bf16 %v870_v9, %v868_v13 }
 0x22d   : > { %v878_v16 = vpack.c.bf16 %v871_v11, %v869_v14 }
 0x22f   : > { %v844_v53 = vpop.f32.mrf.mxu2 }
 0x230   : > { %v863_v54 = vpop.f32.mrf.mxu3  ;;  %v845_v56 = vadd.f32 %v844_v53, %v801_v52 }
 0x231   : > { %v864_v58 = vadd.f32 %v863_v54, %v801_v52 }
 0x232   : > { %v872_v3 = vmax.f32 %v845_v56, 0.0 }
 0x233   : > { %v873_v7 = vmax.f32 %v864_v58, 0.0 }
 0x237   : > { %v846_v59 = vpop.f32.mrf.mxu2 }
 0x238   : > { %v847_v61 = vadd.f32 %v846_v59, %v806_v55  ;;  %v865_v62 = vpop.f32.mrf.mxu3 }
 0x239   : > { %v866_v1 = vadd.f32 %v865_v62, %v806_v55 }
 0x23a   : > { %v874_v4 = vmax.f32 %v847_v61, 0.0 }
 0x23b   : > { %v875_v8 = vmax.f32 %v866_v1, 0.0 }
 0x23c   : > { %v879_v10 = vpack.c.bf16 %v874_v4, %v872_v3 }
 0x23d   : > { %v880_v12 = vpack.c.bf16 %v875_v8, %v873_v7 }
 0x23e   : > { %897 = vmatpush.bf16.msrb.mxu0 %v879_v10 }
 0x23f   : > { %910 = vmatpush.bf16.msrb.mxu1 %v880_v12 }
 0x242   : > { %898 = vmatpush.bf16.msrb.mxu0 %v877_v15 }
 0x243   : > { %911 = vmatpush.bf16.msrb.mxu1 %v878_v16 }
 0x245   : > { %1121 = vmatmul.msk.bf16.vlgmr.msrb.gmra.mxu0 %vm693_vm4, %v876_v17 }
 0x246   : > { %1122 = vmatmul.msk.bf16.vlgmr.msrb.gmra.mxu1 %vm693_vm4, %v876_v17 }
 0x2c2   : > { %v900_v20 = vpop.f32.mrf.mxu0 }
 0x2c3   : > { %v901_v21 = vadd.f32 %v900_v20, %v887_v19  ;;  %v913_v22 = vpop.f32.mrf.mxu1 }
 0x2c4   : > { %v914_v24 = vadd.f32 %v913_v22, %v887_v19 }
 0x2c5   : > { %v919_v25 = vand.u32 2147483647, %v901_v21  ;;  %v917_v39 = vmax.f32 %v901_v21, 0.0 }
 0x2c6   : > { %v920_v26 = vand.u32 2147483647, %v914_v24  ;;  %v918_v41 = vmax.f32 %v914_v24, 0.0 }
 0x2c7   : > { %v921_v27 = vsub.f32 0.0, %v919_v25 }
 0x2c8   : > { %v922_v28 = vsub.f32 0.0, %v920_v26 }
 0x2c9   : > { %v923_v29 = vmul.f32 1.442695, %v921_v27 }
 0x2ca   : > { %v925_v30 = vmul.f32 1.442695, %v922_v28  ;;  %v902_v31 = vpop.f32.mrf.mxu0 }
 0x2cb   : > { %1206 = vpow2.f32 %v923_v29  ;;  %v915_v32 = vpop.f32.mrf.mxu1 }
 0x2cc   : > { %1208 = vpow2.f32 %v925_v30 }
 0x2d1   : > { %v1207_v33 = vpop.eup %1206 }
 0x2d2   : > { %v1209_v34 = vpop.eup %1208  ;;  %v927_v35 = vadd.f32 1.0, %v1207_v33 }
 0x2d3   : > { %v928_v36 = vadd.f32 1.0, %v1209_v34 }
 0x2d4   : > { %1210 = vlog2.f32 %v927_v35 }
 0x2d5   : > { %1212 = vlog2.f32 %v928_v36 }
 0x2da   : > { %v1211_v37 = vpop.eup %1210 }
 0x2db   : > { %v1213_v38 = vpop.eup %1212  ;;  %v930_v40 = vmul.f32 0.6931472, %v1211_v37 }
 0x2dc   : > { %v932_v42 = vmul.f32 0.6931472, %v1213_v38 }
 0x2dd   : > { %v933_v43 = vadd.f32 %v930_v40, %v917_v39 }
 0x2de   : > { %v934_v44 = vadd.f32 %v932_v42, %v918_v41 }
 0x2df   : > { %1214 = vrcp.f32 %v933_v43  ;;  %vm935_vm9 = vcmp.gt.f32.partialorder %v933_v43, 0.0 }
 0x2e0   : > { %1216 = vrcp.f32 %v934_v44  ;;  %vm936_vm10 = vcmp.gt.f32.partialorder %v934_v44, 0.0 }
 0x2e5   : > { %v1215_v45 = vpop.eup %1214 }
 0x2e6   : > { %v1217_v47 = vpop.eup %1216  ;;  %v939_v48 = vsel %vm935_vm9, %v1215_v45, 0.0 }
 0x2e7   : > { %v940_v49 = vsel %vm936_vm10, %v1217_v47, 0.0  ;;  %v942_v50 = vmul.f32 %v941_v46, %v939_v48 }
 0x2e8   : > { %v943_v51 = vmul.f32 %v941_v46, %v940_v49 }
 0x2e9   : > { %v944_v53 = vadd.f32 %v942_v50, %v1493_v23 }
 0x2ea   : > { %v945_v52 = vadd.f32 %v943_v51, %v1493_v23 }
 0x2ec   : > { %v948_v54 = vrot.slane %v945_v52, 7 }
 0x2ee   : > { %v950_v55 = vsel %vm949_vm11, %v944_v53, %v948_v54 }
 0x2ef   : > { %952 = vst.msk [vmem:[%s550_s21] sm:$0x3] %vm1445_vm0, %v950_v55 }
 0x2f0 PF: > { %s27_s29 = sadd.s32 1, %s1293_s29   ;;  %s1553_s27 = smov %s1289_s28 }
 0x2f1   : > { %p24_p8 = scmp.ge.s32.totalorder %s27_s29, 4   ;;  %s1554_s28 = smov %s1556_s18 }
 0x2f3   :  { %26 = sbr.rel (!%p24_p8) target bundleno = 6 (0x6), region = 121 }
 0x2f8   :  { %981 = vsyncpa [#allocation5], 1 }
 0x2f9   :  { %983 = vsyncpa [#allocation5 + $0x1], 1 }
 0x2fa   :  { %984 = vsyncpa [#allocation7], 1 }

</bundles_post_ra>
